<compile_context>
chip_gen: v7x
topology: tpu7x:2x2x1
jax: 0.10.0
libtpu: 0.0.40
codegen_flags: <defaults>
</compile_context>

<pallas_src>
import functools

import jax
import jax.numpy as jnp
from jax.experimental import pallas as pl
from jax.experimental.pallas import tpu as pltpu


def _char_cnn_kernel(chars_ref, emb_ref, w_ref, b_ref, o_ref, *, S, B, W, K):
    # chars_ref: [W*B*S, 1] int32  char ids, rows ordered (w, b, s)
    # emb_ref:   [V, OC]    f32    char-embedding table with each column repeated
    #                              F times (emb_rep[:, o] = char_emb[:, o // F])
    # w_ref:     [K, OC]    f32    grouped-conv taps, w[k, o] = conv_w[o, 0, k]
    # b_ref:     [1, OC]    f32    conv bias
    # o_ref:     [S, B*OC]  f32    lane-dense output, o_ref[s, b*OC+o]
    N = chars_ref.shape[0]
    V, OC = emb_ref.shape
    L = W - K + 1                                   # valid-conv output length

    # Fused embedding gather + channel repeat as a single small MXU matmul.
    ids = chars_ref[...]                                            # [N, 1] i32
    iota = jax.lax.broadcasted_iota(jnp.int32, (N, V), 1)
    onehot = (ids == iota).astype(jnp.float32)                      # [N, V]
    x = jnp.dot(onehot, emb_ref[...],
                preferred_element_type=jnp.float32)                 # [N, OC]

    # Leading-dim split only (last dim unchanged): cheap re-tiling.
    x3 = x.reshape(W, B * S, OC)                                    # [W, BS, OC]

    w = w_ref[...]                                                  # [K, OC]
    # Conv taps slice the leading axis -> no sublane-unaligned slicing.
    acc = x3[0:L] * w[0][None, None, :]                             # [L, BS, OC]
    for j in range(1, K):                                           # small static loop
        acc = acc + x3[j:j + L] * w[j][None, None, :]

    m = jnp.max(acc, axis=0)                                        # [BS, OC], VPU max
    m = m + b_ref[...]                                              # bias after max

    # Lane-dense [S, B*OC] layout: per-batch row blocks concatenated along lanes.
    parts = [m[b * S:(b + 1) * S, :] for b in range(B)]
    o_ref[...] = jnp.concatenate(parts, axis=-1) if B > 1 else parts[0]


def char_cnn_max(chars, char_emb, conv_w, conv_b, filter_num, kernel_size):
    # chars:   [B, S, W] int32
    # char_emb:[V, C] f32 ; conv_w: [OC, 1, K] f32 ; conv_b: [OC] f32
    # returns: [S, B, OC] f32  (max over conv positions, grouped Conv1d semantics)
    B, S, W = chars.shape
    V, C = char_emb.shape
    F, K = filter_num, kernel_size
    OC = C * F
    assert W >= K, "word_len must be >= char_cnn_kernel_size (valid conv)"

    # Rows ordered (w, b, s) so the kernel's tap slices hit the leading axis.
    chars_flat = jnp.transpose(chars, (2, 0, 1)).reshape(W * B * S, 1)
    # Fold the grouped-conv channel repeat into the (tiny) table: [V, OC].
    emb_rep = jnp.repeat(char_emb, F, axis=1)
    w_t = jnp.transpose(conv_w[:, 0, :], (1, 0))                    # [K, OC]
    b2 = conv_b[None, :]                                            # [1, OC]

    kernel = functools.partial(_char_cnn_kernel, S=S, B=B, W=W, K=K)
    out2d = pl.pallas_call(
        kernel,
        out_shape=jax.ShapeDtypeStruct((S, B * OC), jnp.float32),
        grid_spec=pltpu.PrefetchScalarGridSpec(
            num_scalar_prefetch=0,
            grid=(1,),                                   # single step: data is tiny
            in_specs=[
                pl.BlockSpec((W * B * S, 1), lambda i: (0, 0)),
                pl.BlockSpec((V, OC), lambda i: (0, 0)),
                pl.BlockSpec((K, OC), lambda i: (0, 0)),
                pl.BlockSpec((1, OC), lambda i: (0, 0)),
            ],
            out_specs=pl.BlockSpec((S, B * OC), lambda i: (0, 0)),
        ),
        compiler_params=pltpu.CompilerParams(
            # Single grid step: no megacore split (would only duplicate overhead).
            dimension_semantics=("arbitrary",)),
    )(chars_flat, emb_rep, w_t, b2)
    # out2d[s, b*OC + o] -> [S, B, OC]
    return out2d.reshape(S, B, OC)


def init_params(key, word_input_dim, word_emb_dim, char_input_dim, char_emb_dim,
                filter_num, kernel_size, word_pad_idx, char_pad_idx):
    k1, k2, k3, k4 = jax.random.split(key, 4)
    word_emb = 0.1 * jax.random.normal(k1, (word_input_dim, word_emb_dim), jnp.float32)
    word_emb = word_emb.at[word_pad_idx].set(0.0)          # zero padding row
    char_emb = 0.1 * jax.random.normal(k2, (char_input_dim, char_emb_dim), jnp.float32)
    char_emb = char_emb.at[char_pad_idx].set(0.0)          # zero padding row
    out_ch = char_emb_dim * filter_num
    # PyTorch nn.Conv1d(groups=char_emb_dim): weight [out_ch, 1, K], bias [out_ch]
    conv_w = 0.1 * jax.random.normal(k3, (out_ch, 1, kernel_size), jnp.float32)
    conv_b = 0.1 * jax.random.normal(k4, (out_ch,), jnp.float32)
    return dict(word_emb=word_emb, char_emb=char_emb, conv_w=conv_w, conv_b=conv_b)


def embeddings_forward(params, words, chars, filter_num, kernel_size):
    # words: [S, B] int32 ; chars: [B, S, W] int32
    # Word embedding lookup stays an XLA gather (large vocab); dropout == identity.
    word_out = jnp.take(params["word_emb"], words, axis=0)          # [S, B, Dw]
    char_max = char_cnn_max(chars, params["char_emb"], params["conv_w"],
                            params["conv_b"], filter_num, kernel_size)  # [S, B, OC]
    return jnp.concatenate([word_out, char_max], axis=2)            # [S, B, Dw+OC]


def _reference_char_cnn_max(chars, char_emb, conv_w, conv_b, filter_num, kernel_size):
    # Pure-JAX reference of the grouped Conv1d + max over positions (for checking).
    emb = jnp.take(char_emb, chars, axis=0)                         # [B, S, W, C]
    B, S, W, C = emb.shape
    F, K = filter_num, kernel_size
    L = W - K + 1
    x_rep = jnp.repeat(emb, F, axis=-1)                             # [B, S, W, OC]
    acc = jnp.zeros((B, S, L, C * F), jnp.float32)
    for k in range(K):
        acc = acc + x_rep[:, :, k:k + L, :] * conv_w[:, 0, k][None, None, None, :]
    acc = acc + conv_b[None, None, None, :]
    return jnp.transpose(jnp.max(acc, axis=2), (1, 0, 2))           # [S, B, OC]


if __name__ == "__main__":
    key = jax.random.PRNGKey(0)
    sent_len, batch, word_len = 8, 2, 16
    word_input_dim, word_emb_dim = 100, 32
    char_input_dim, char_emb_dim = 40, 16
    filter_num, kernel_size = 4, 3
    word_pad_idx, char_pad_idx = 0, 0

    kp, kw, kc = jax.random.split(key, 3)
    params = init_params(kp, word_input_dim, word_emb_dim, char_input_dim,
                         char_emb_dim, filter_num, kernel_size,
                         word_pad_idx, char_pad_idx)

    words = jax.random.randint(kw, (sent_len, batch), 0, word_input_dim,
                               dtype=jnp.int32)
    chars = jax.random.randint(kc, (batch, sent_len, word_len), 0,
                               char_input_dim, dtype=jnp.int32)

    out = embeddings_forward(params, words, chars, filter_num, kernel_size)
    out = jax.block_until_ready(out)

    assert out.shape == (sent_len, batch,
                         word_emb_dim + char_emb_dim * filter_num)
    assert out.dtype == jnp.float32

    # Correctness check against a pure-JAX reference of the torch module.
    word_ref = jnp.take(params["word_emb"], words, axis=0)
    char_ref = _reference_char_cnn_max(chars, params["char_emb"], params["conv_w"],
                                       params["conv_b"], filter_num, kernel_size)
    ref = jnp.concatenate([word_ref, char_ref], axis=2)
    max_err = float(jnp.max(jnp.abs(out - ref)))
    assert max_err < 1e-3, f"mismatch vs reference: {max_err}"

    print("KERNEL_OK")
</pallas_src>

<mosaic_0001>
module attributes {stable_mosaic.version = 11 : i64} {
  func.func @_char_cnn_kernel(%arg0: i32, %arg1: memref<256x1xi32, #tpu.memory_space<vmem>>, %arg2: memref<40x64xf32, #tpu.memory_space<vmem>>, %arg3: memref<3x64xf32, #tpu.memory_space<vmem>>, %arg4: memref<1x64xf32, #tpu.memory_space<vmem>>, %arg5: memref<8x128xf32, #tpu.memory_space<vmem>>) attributes {dimension_semantics = [#tpu.dimension_semantics<arbitrary>], iteration_bounds = array<i64: 1>, scalar_prefetch = 0 : i64, scratch_operands = 0 : i64, tpu.core_type = #tpu.core_type<tc>, window_params = [{pipeline_mode = #tpu.pipeline_mode<synchronous>, transform_indices = @transform_0, window_bounds = array<i64: 256, 1>}, {pipeline_mode = #tpu.pipeline_mode<synchronous>, transform_indices = @transform_1, window_bounds = array<i64: 40, 64>}, {pipeline_mode = #tpu.pipeline_mode<synchronous>, transform_indices = @transform_2, window_bounds = array<i64: 3, 64>}, {pipeline_mode = #tpu.pipeline_mode<synchronous>, transform_indices = @transform_3, window_bounds = array<i64: 1, 64>}, {pipeline_mode = #tpu.pipeline_mode<synchronous>, transform_indices = @transform_4, window_bounds = array<i64: 8, 128>}]} {
    %c0 = arith.constant 0 : index
    %c0_0 = arith.constant 0 : index
    %0 = vector.load %arg1[%c0, %c0_0] : memref<256x1xi32, #tpu.memory_space<vmem>>, vector<256x1xi32>
    %1 = tpu.iota {dimensions = array<i32: 1>} : vector<256x40xi32>
    %2 = vector.broadcast %0 : vector<256x1xi32> to vector<256x40xi32>
    %3 = arith.cmpi eq, %2, %1 : vector<256x40xi32>
    %4 = arith.extui %3 : vector<256x40xi1> to vector<256x40xi32>
    %5 = arith.sitofp %4 : vector<256x40xi32> to vector<256x40xf32>
    %c0_1 = arith.constant 0 : index
    %c0_2 = arith.constant 0 : index
    %6 = vector.load %arg2[%c0_1, %c0_2] : memref<40x64xf32, #tpu.memory_space<vmem>>, vector<40x64xf32>
    %cst = arith.constant dense<0.000000e+00> : vector<256x64xf32>
    %7 = tpu.matmul %5, %6, %cst {dimension_numbers = #tpu.dot_dimension_numbers<[1], [0], [0], [1], [0, 0, 1, 1], [], []>} : vector<256x40xf32>, vector<40x64xf32>, vector<256x64xf32> -> vector<256x64xf32>
    %8 = vector.shape_cast %7 : vector<256x64xf32> to vector<16x16x64xf32>
    %c0_3 = arith.constant 0 : index
    %c0_4 = arith.constant 0 : index
    %9 = vector.load %arg3[%c0_3, %c0_4] : memref<3x64xf32, #tpu.memory_space<vmem>>, vector<3x64xf32>
    %10 = vector.extract_strided_slice %8 {offsets = [0, 0, 0], sizes = [14, 16, 64], strides = [1, 1, 1]} : vector<16x16x64xf32> to vector<14x16x64xf32>
    %11 = vector.extract_strided_slice %9 {offsets = [0, 0], sizes = [1, 64], strides = [1, 1]} : vector<3x64xf32> to vector<1x64xf32>
    %12 = vector.shape_cast %11 : vector<1x64xf32> to vector<64xf32>
    %13 = vector.shape_cast %12 : vector<64xf32> to vector<1x1x64xf32>
    %14 = vector.broadcast %13 : vector<1x1x64xf32> to vector<14x16x64xf32>
    %15 = arith.mulf %10, %14 : vector<14x16x64xf32>
    %16 = vector.extract_strided_slice %8 {offsets = [1, 0, 0], sizes = [14, 16, 64], strides = [1, 1, 1]} : vector<16x16x64xf32> to vector<14x16x64xf32>
    %17 = vector.extract_strided_slice %9 {offsets = [1, 0], sizes = [1, 64], strides = [1, 1]} : vector<3x64xf32> to vector<1x64xf32>
    %18 = vector.shape_cast %17 : vector<1x64xf32> to vector<64xf32>
    %19 = vector.shape_cast %18 : vector<64xf32> to vector<1x1x64xf32>
    %20 = vector.broadcast %19 : vector<1x1x64xf32> to vector<14x16x64xf32>
    %21 = arith.mulf %16, %20 : vector<14x16x64xf32>
    %22 = arith.addf %15, %21 : vector<14x16x64xf32>
    %23 = vector.extract_strided_slice %8 {offsets = [2, 0, 0], sizes = [14, 16, 64], strides = [1, 1, 1]} : vector<16x16x64xf32> to vector<14x16x64xf32>
    %24 = vector.extract_strided_slice %9 {offsets = [2, 0], sizes = [1, 64], strides = [1, 1]} : vector<3x64xf32> to vector<1x64xf32>
    %25 = vector.shape_cast %24 : vector<1x64xf32> to vector<64xf32>
    %26 = vector.shape_cast %25 : vector<64xf32> to vector<1x1x64xf32>
    %27 = vector.broadcast %26 : vector<1x1x64xf32> to vector<14x16x64xf32>
    %28 = arith.mulf %23, %27 : vector<14x16x64xf32>
    %29 = arith.addf %22, %28 : vector<14x16x64xf32>
    %cst_5 = arith.constant dense<0xFF800000> : vector<16x64xf32>
    %30 = vector.multi_reduction <maximumf>, %29, %cst_5 [0] : vector<14x16x64xf32> to vector<16x64xf32>
    %c0_6 = arith.constant 0 : index
    %c0_7 = arith.constant 0 : index
    %31 = vector.load %arg4[%c0_6, %c0_7] : memref<1x64xf32, #tpu.memory_space<vmem>>, vector<1x64xf32>
    %32 = vector.broadcast %31 : vector<1x64xf32> to vector<16x64xf32>
    %33 = arith.addf %30, %32 : vector<16x64xf32>
    %34 = vector.extract_strided_slice %33 {offsets = [0, 0], sizes = [8, 64], strides = [1, 1]} : vector<16x64xf32> to vector<8x64xf32>
    %35 = vector.extract_strided_slice %33 {offsets = [8, 0], sizes = [8, 64], strides = [1, 1]} : vector<16x64xf32> to vector<8x64xf32>
    %36 = tpu.concatenate %34, %35 in 1 : vector<8x64xf32>, vector<8x64xf32> -> vector<8x128xf32>
    %c0_8 = arith.constant 0 : index
    %c0_9 = arith.constant 0 : index
    %37 = vector.load %arg5[%c0_8, %c0_9] : memref<8x128xf32, #tpu.memory_space<vmem>>, vector<8x128xf32>
    tpu.vector_store %arg5[%c0_8, %c0_9], %36 {strides = array<i32>} : memref<8x128xf32, #tpu.memory_space<vmem>>, vector<8x128xf32>,
    return
  }
  func.func @transform_0(%arg0: i32) -> (i32, i32) {
    %c0_i32 = arith.constant 0 : i32
    %c0_i32_0 = arith.constant 0 : i32
    %c0_i32_1 = arith.constant 0 : i32
    return %c0_i32, %c0_i32_0 : i32, i32
  }
  func.func @transform_1(%arg0: i32) -> (i32, i32) {
    %c0_i32 = arith.constant 0 : i32
    %c0_i32_0 = arith.constant 0 : i32
    %c0_i32_1 = arith.constant 0 : i32
    return %c0_i32, %c0_i32_0 : i32, i32
  }
  func.func @transform_2(%arg0: i32) -> (i32, i32) {
    %c0_i32 = arith.constant 0 : i32
    %c0_i32_0 = arith.constant 0 : i32
    %c0_i32_1 = arith.constant 0 : i32
    return %c0_i32, %c0_i32_0 : i32, i32
  }
  func.func @transform_3(%arg0: i32) -> (i32, i32) {
    %c0_i32 = arith.constant 0 : i32
    %c0_i32_0 = arith.constant 0 : i32
    %c0_i32_1 = arith.constant 0 : i32
    return %c0_i32, %c0_i32_0 : i32, i32
  }
  func.func @transform_4(%arg0: i32) -> (i32, i32) {
    %c0_i32 = arith.constant 0 : i32
    %c0_i32_0 = arith.constant 0 : i32
    %c0_i32_1 = arith.constant 0 : i32
    return %c0_i32, %c0_i32_0 : i32, i32
  }
}

</mosaic_0001>

<bundles_post_ra>
// kernel: tpu_custom_call.1
= control target key start
LH: loop header
LB: loop body
LE: loop exit
PB: predicated region body
PF: predicated region fallthrough
CT: control target
= control target key end

     0   :  { %v1012_v2 = vmov 0   ;;  %s1465_s0 = inlined_call_operand.vmem [shape: s32[256,1], index: 0, kind: input, shape index: {}]   ;;  %s1466_s1 = inlined_call_operand.vmem [shape: f32[40,64], index: 1, kind: input, shape index: {}]   ;;  %s1467_s2 = inlined_call_operand.vmem [shape: f32[3,64], index: 2, kind: input, shape index: {}]   ;;  %s1468_s3 = inlined_call_operand.vmem [shape: f32[1,64], index: 3, kind: input, shape index: {}]   ;;  %s1469_s4 = inlined_call_operand.hbm [shape: f32[8,128], index: 4, kind: output, shape index: {}]  }
   0x1   :  { %v20_v0 = vld [vmem:[%s1465_s0 + $0x10] sm:$0xff]  ;;  %v18_v1 = vld [vmem:[%s1465_s0] sm:$0xff]  ;;  %987 = vset.pattern.permute.xlu1 %v1012_v2  ;;  %986 = vset.pattern.permute.xlu0 %v1012_v2  ;;  %v21_v3 = vld [vmem:[%s1465_s0 + $0x18] sm:$0xff] }
   0x2   :  { %59 = vperm.xlu1 %987, %v20_v0   ;;  %53 = vperm.xlu0 %986, %v18_v1   ;;  %v19_v4 = vld [vmem:[%s1465_s0 + $0x8] sm:$0xff]  ;;  %v34_v5 = vld [vmem:[%s1465_s0 + $0x80] sm:$0xff]  ;;  %v246_v11 = vld [vmem:[%s1466_s1 + $0x10] sm:$0xff] }
   0x3   :  { %v22_v6 = vld [vmem:[%s1465_s0 + $0x20] sm:$0xff]  ;;  %v35_v7 = vld [vmem:[%s1465_s0 + $0x88] sm:$0xff]  ;;  %v247_v12 = vld [vmem:[%s1466_s1 + $0x18] sm:$0xff] }
   0x4   :  { %v23_v8 = vld [vmem:[%s1465_s0 + $0x28] sm:$0xff]  ;;  %v244_v9 = vld [vmem:[%s1466_s1] sm:$0xff] }
   0x5   :  { %v245_v10 = vld [vmem:[%s1466_s1 + $0x8] sm:$0xff] }
   0x6   :  { %62 = vperm.xlu1 %987, %v21_v3   ;;  %56 = vperm.xlu0 %986, %v19_v4   ;;  %v968_v13 = vpack.c.bf16 %v245_v10, %v244_v9 }
   0xa   :  { %101 = vperm.xlu1 %987, %v34_v5   ;;  %65 = vperm.xlu0 %986, %v22_v6  }
   0xb   :  { %9 = vsyncpa [#allocation3], 0  ;;  %v972_v14 = vpack.c.bf16 %v247_v12, %v246_v11  ;;  %v36_v15 = vld [vmem:[%s1465_s0 + $0x90] sm:$0xff]  ;;  %969 = vmatprep.subr.bf16.mxu0 %v968_v13  ;;  %976 = vmatprep.subr.bf16.mxu1 %v968_v13  ;;  %v248_v17 = vld [vmem:[%s1466_s1 + $0x20] sm:$0xff]  ;;  %v50_v40 = vlaneseq  ;;  %vm249_vm0 = vcmask 326656   ;;  %v1013_v44 = vmov 0.0  }
   0xc   :  { %v24_v16 = vld [vmem:[%s1465_s0 + $0x30] sm:$0xff]  ;;  %971 = vmatpush3.bf16.msra.mxu0 %v968_v13  ;;  %979 = vmatpush3.bf16.msra.mxu1 %v968_v13  ;;  %v37_v18 = vld [vmem:[%s1465_s0 + $0x98] sm:$0xff]  ;;  %v38_v20 = vld [vmem:[%s1465_s0 + $0xa0] sm:$0xff]  ;;  %s1014_s11 = smov 64   ;;  %s1015_s12 = smov [#allocation2]  }
   0xd   :  { %973 = vmatprep.subr.bf16.mxu0 %v972_v14  ;;  %977 = vmatprep.subr.bf16.mxu1 %v972_v14  ;;  %v25_v19 = vld [vmem:[%s1465_s0 + $0x38] sm:$0xff]  ;;  %v26_v21 = vld [vmem:[%s1465_s0 + $0x40] sm:$0xff]  ;;  %v39_v22 = vld [vmem:[%s1465_s0 + $0xa8] sm:$0xff]  ;;  %v1153_v41 = vand.u32 127, %v50_v40  ;;  %s800_s13 = sshll.u32 %s1015_s12, 4  ;;  %s801_s13 = int_to_ptr.vmem [resolvable:$true] %s800_s13 }
   0xe   :  { %104 = vperm.xlu1 %987, %v35_v7   ;;  %68 = vperm.xlu0 %986, %v23_v8   ;;  %v27_v23 = vld [vmem:[%s1465_s0 + $0x48] sm:$0xff]  ;;  %v40_v24 = vld [vmem:[%s1465_s0 + $0xb0] sm:$0xff]  ;;  %v41_v26 = vld [vmem:[%s1465_s0 + $0xb8] sm:$0xff]  ;;  %s988_s14 = scalar_lea.vmem %s801_s13, 128  ;;  %p993_p1 = scmp.lt.s32.totalorder %s801_s13, %s801_s13 }
   0xf   :  { %v28_v25 = vld [vmem:[%s1465_s0 + $0x50] sm:$0xff]  ;;  %v29_v27 = vld [vmem:[%s1465_s0 + $0x58] sm:$0xff]  ;;  %v42_v28 = vld [vmem:[%s1465_s0 + $0xc0] sm:$0xff]  ;;  %p989_p0 = scmp.ne.s32.totalorder %s801_s13, %s988_s14  ;;  %p994_p2 = scmp.lt.s32.totalorder %s988_s14, %s988_s14 }
  0x10   :  { %975 = vmatpush3.bf16.msra.mxu0 %v972_v14  ;;  %980 = vmatpush3.bf16.msra.mxu1 %v972_v14  ;;  %v30_v29 = vld [vmem:[%s1465_s0 + $0x60] sm:$0xff]  ;;  %v43_v30 = vld [vmem:[%s1465_s0 + $0xc8] sm:$0xff]  ;;  %v44_v32 = vld [vmem:[%s1465_s0 + $0xd0] sm:$0xff] }
  0x11   :  { %918 = vmatprep.subr.mxu0 %v248_v17  ;;  %978 = vmatprep.subr.mxu1 %v248_v17  ;;  %v31_v31 = vld [vmem:[%s1465_s0 + $0x68] sm:$0xff]  ;;  %v32_v33 = vld [vmem:[%s1465_s0 + $0x70] sm:$0xff]  ;;  %v45_v34 = vld [vmem:[%s1465_s0 + $0xd8] sm:$0xff]  ;;  %p995_p3 = por %p994_p2, %p993_p1 }
  0x12   :  { %107 = vperm.xlu1 %987, %v36_v15   ;;  %71 = vperm.xlu0 %986, %v24_v16   ;;  %v33_v35 = vld [vmem:[%s1465_s0 + $0x78] sm:$0xff]  ;;  %v47_v36 = vld [vmem:[%s1465_s0 + $0xe8] sm:$0xff]  ;;  %v46_v37 = vld [vmem:[%s1465_s0 + $0xe0] sm:$0xff] }
  0x13   :  { %v49_v38 = vld [vmem:[%s1465_s0 + $0xf8] sm:$0xff]  ;;  %v48_v39 = vld [vmem:[%s1465_s0 + $0xf0] sm:$0xff]  ;;  %p996_p4 = pnand %p995_p3, %p989_p0 }
  0x14   :  { %919 = vmatpush3.msra.mxu0 %v248_v17  ;;  %981 = vmatpush3.msra.mxu1 %v248_v17 }
  0x16   :  { %110 = vperm.xlu1 %987, %v37_v18   ;;  %74 = vperm.xlu0 %986, %v25_v19  }
  0x1a   :  { %113 = vperm.xlu1 %987, %v38_v20   ;;  %77 = vperm.xlu0 %986, %v26_v21  }
  0x1e   :  { %116 = vperm.xlu1 %987, %v39_v22   ;;  %80 = vperm.xlu0 %986, %v27_v23  }
  0x22   :  { %119 = vperm.xlu1 %987, %v40_v24   ;;  %83 = vperm.xlu0 %986, %v28_v25  }
  0x26   :  { %122 = vperm.xlu1 %987, %v41_v26   ;;  %86 = vperm.xlu0 %986, %v29_v27  }
  0x2a   :  { %125 = vperm.xlu1 %987, %v42_v28   ;;  %89 = vperm.xlu0 %986, %v30_v29  }
  0x2e   :  { %128 = vperm.xlu1 %987, %v43_v30   ;;  %92 = vperm.xlu0 %986, %v31_v31  }
  0x32   :  { %131 = vperm.xlu1 %987, %v44_v32   ;;  %95 = vperm.xlu0 %986, %v32_v33  }
  0x36   :  { %134 = vperm.xlu1 %987, %v45_v34   ;;  %98 = vperm.xlu0 %986, %v33_v35  }
  0x3a   :  { %140 = vperm.xlu1 %987, %v47_v36   ;;  %137 = vperm.xlu0 %986, %v46_v37  }
  0x3e   :  { %146 = vperm.xlu1 %987, %v49_v38   ;;  %143 = vperm.xlu0 %986, %v48_v39  }
  0x81   :  { %v60_v42 = vpop.permute.xlu1 %59  ;;  %v54_v43 = vpop.permute.xlu0 %53 }
  0x82   :  { %vm148_vm1 = vcmp.eq.s32.totalorder %v54_v43, %v1153_v41  ;;  %vm150_vm2 = vcmp.eq.s32.totalorder %v60_v42, %v1153_v41 }
  0x83   :  { %v808_v45 = vsel %vm148_vm1, 1.0, %v1013_v44  ;;  %v810_v49 = vsel %vm150_vm2, 1.0, %v1013_v44 }
  0x84   :  { %920 = vmatprep.mubr.msk.f32.mxu0 %vm249_vm0, %v808_v45 }
  0x85   :  { %v63_v46 = vpop.permute.xlu1 %62  ;;  %v57_v47 = vpop.permute.xlu0 %56 }
  0x86   :  { %vm149_vm3 = vcmp.eq.s32.totalorder %v57_v47, %v1153_v41  ;;  %vm151_vm4 = vcmp.eq.s32.totalorder %v63_v46, %v1153_v41  ;;  %v573_v46 = vshrl.u32 %v50_v40, 7 }
  0x87   :  { %v809_v48 = vsel %vm149_vm3, 1.0, %v1013_v44  ;;  %v811_v52 = vsel %vm151_vm4, 1.0, %v1013_v44 }
  0x88   :  { %921 = vmatmul.mubr.msk.f32.vlgmr.msra.gmra.mrb[0].mxu0 %vm249_vm0, %v809_v48  ;;  %v574_v47 = vsub.s32 0, %v573_v46  ;;  %v571_v48 = vld [vmem:[%s1467_s2] sm:$0x7] }
  0x89   :  { %v102_v50 = vpop.permute.xlu1 %101  ;;  %923 = vmatprep.mubr.msk.f32.mxu0 %vm249_vm0, %v810_v49  ;;  %v66_v51 = vpop.permute.xlu0 %65  ;;  %v606_v49 = vsub.s32 1, %v573_v46 }
  0x8a   :  { %vm164_vm5 = vcmp.eq.s32.totalorder %v102_v50, %v1153_v41  ;;  %vm152_vm6 = vcmp.eq.s32.totalorder %v66_v51, %v1153_v41  ;;  %v1255_v50 = vrot.slane %v571_v48, %v574_v47 }
  0x8b   :  { %v812_v53 = vsel %vm152_vm6, 1.0, %v1013_v44  ;;  %v824_v54 = vsel %vm164_vm5, 1.0, %v1013_v44 }
  0x8c   :  { %924 = vmatmul.mubr.msk.f32.gmra.mrb[2].mxu0 %vm249_vm0, %v811_v52  ;;  %944 = vmatprep.mubr.msk.f32.mxu1 %vm249_vm0, %v824_v54  ;;  %v1257_v52 = vrot.slane %v571_v48, %v606_v49 }
  0x8d   :  { %v105_v55 = vpop.permute.xlu1 %104  ;;  %926 = vmatprep.mubr.msk.f32.mxu0 %vm249_vm0, %v812_v53  ;;  %v69_v56 = vpop.permute.xlu0 %68  ;;  %v666_v53 = vsub.s32 2, %v573_v46 }
  0x8e   :  { %vm165_vm7 = vcmp.eq.s32.totalorder %v105_v55, %v1153_v41  ;;  %vm153_vm8 = vcmp.eq.s32.totalorder %v69_v56, %v1153_v41 }
  0x8f   :  { %v825_v57 = vsel %vm165_vm7, 1.0, %v1013_v44  ;;  %v813_v58 = vsel %vm153_vm8, 1.0, %v1013_v44 }
  0x90   :  { %927 = vmatmul.mubr.msk.f32.gmra.mrb[4].mxu0 %vm249_vm0, %v813_v58  ;;  %945 = vmatmul.mubr.msk.f32.vlgmr.msra.gmra.mrb[0].mxu1 %vm249_vm0, %v825_v57  ;;  %v1262_v57 = vrot.slane %v571_v48, %v666_v53 }
  0x91   :  { %v108_v59 = vpop.permute.xlu1 %107  ;;  %v72_v60 = vpop.permute.xlu0 %71 }
  0x92   :  { %vm166_vm9 = vcmp.eq.s32.totalorder %v108_v59, %v1153_v41  ;;  %vm154_vm10 = vcmp.eq.s32.totalorder %v72_v60, %v1153_v41 }
  0x93   :  { %v826_v61 = vsel %vm166_vm9, 1.0, %v1013_v44  ;;  %v814_v62 = vsel %vm154_vm10, 1.0, %v1013_v44 }
  0x94   :  { %929 = vmatprep.mubr.msk.f32.mxu0 %vm249_vm0, %v814_v62  ;;  %947 = vmatprep.mubr.msk.f32.mxu1 %vm249_vm0, %v826_v61 }
  0x95   :  { %v111_v63 = vpop.permute.xlu1 %110  ;;  %v75_v0 = vpop.permute.xlu0 %74 }
  0x96   :  { %vm167_vm11 = vcmp.eq.s32.totalorder %v111_v63, %v1153_v41  ;;  %vm155_vm12 = vcmp.eq.s32.totalorder %v75_v0, %v1153_v41 }
  0x97   :  { %v827_v1 = vsel %vm167_vm11, 1.0, %v1013_v44  ;;  %v815_v2 = vsel %vm155_vm12, 1.0, %v1013_v44 }
  0x98   :  { %930 = vmatmul.mubr.msk.f32.gmra.mrb[6].mxu0 %vm249_vm0, %v815_v2  ;;  %948 = vmatmul.mubr.msk.f32.gmra.mrb[2].mxu1 %vm249_vm0, %v827_v1 }
  0x99   :  { %v114_v3 = vpop.permute.xlu1 %113  ;;  %v78_v4 = vpop.permute.xlu0 %77 }
  0x9a   :  { %vm168_vm13 = vcmp.eq.s32.totalorder %v114_v3, %v1153_v41  ;;  %vm156_vm14 = vcmp.eq.s32.totalorder %v78_v4, %v1153_v41 }
  0x9b   :  { %v828_v5 = vsel %vm168_vm13, 1.0, %v1013_v44  ;;  %v816_v6 = vsel %vm156_vm14, 1.0, %v1013_v44 }
  0x9c   :  { %932 = vmatprep.mubr.msk.f32.mxu0 %vm249_vm0, %v816_v6  ;;  %950 = vmatprep.mubr.msk.f32.mxu1 %vm249_vm0, %v828_v5 }
  0x9d   :  { %v117_v7 = vpop.permute.xlu1 %116  ;;  %v81_v8 = vpop.permute.xlu0 %80 }
  0x9e   :  { %vm169_vm15 = vcmp.eq.s32.totalorder %v117_v7, %v1153_v41  ;;  %vm157_vm1 = vcmp.eq.s32.totalorder %v81_v8, %v1153_v41 }
  0x9f   :  { %v829_v9 = vsel %vm169_vm15, 1.0, %v1013_v44  ;;  %v817_v10 = vsel %vm157_vm1, 1.0, %v1013_v44 }
  0xa0   :  { %933 = vmatmul.mubr.msk.f32.gmra.mrb[8].mxu0 %vm249_vm0, %v817_v10  ;;  %951 = vmatmul.mubr.msk.f32.gmra.mrb[4].mxu1 %vm249_vm0, %v829_v9 }
  0xa1   :  { %v120_v11 = vpop.permute.xlu1 %119  ;;  %v84_v12 = vpop.permute.xlu0 %83 }
  0xa2   :  { %vm170_vm2 = vcmp.eq.s32.totalorder %v120_v11, %v1153_v41  ;;  %vm158_vm3 = vcmp.eq.s32.totalorder %v84_v12, %v1153_v41 }
  0xa3   :  { %v830_v13 = vsel %vm170_vm2, 1.0, %v1013_v44  ;;  %v818_v14 = vsel %vm158_vm3, 1.0, %v1013_v44 }
  0xa4   :  { %935 = vmatprep.mubr.msk.f32.mxu0 %vm249_vm0, %v818_v14  ;;  %953 = vmatprep.mubr.msk.f32.mxu1 %vm249_vm0, %v830_v13 }
  0xa5   :  { %v123_v15 = vpop.permute.xlu1 %122  ;;  %v87_v16 = vpop.permute.xlu0 %86 }
  0xa6   :  { %vm171_vm4 = vcmp.eq.s32.totalorder %v123_v15, %v1153_v41  ;;  %vm159_vm5 = vcmp.eq.s32.totalorder %v87_v16, %v1153_v41 }
  0xa7   :  { %v831_v17 = vsel %vm171_vm4, 1.0, %v1013_v44  ;;  %v819_v18 = vsel %vm159_vm5, 1.0, %v1013_v44 }
  0xa8   :  { %936 = vmatmul.mubr.msk.f32.gmra.mrb[10].mxu0 %vm249_vm0, %v819_v18  ;;  %954 = vmatmul.mubr.msk.f32.gmra.mrb[6].mxu1 %vm249_vm0, %v831_v17 }
  0xa9   :  { %v126_v19 = vpop.permute.xlu1 %125  ;;  %v90_v20 = vpop.permute.xlu0 %89 }
  0xaa   :  { %vm172_vm6 = vcmp.eq.s32.totalorder %v126_v19, %v1153_v41  ;;  %vm160_vm7 = vcmp.eq.s32.totalorder %v90_v20, %v1153_v41 }
  0xab   :  { %v832_v21 = vsel %vm172_vm6, 1.0, %v1013_v44  ;;  %v820_v22 = vsel %vm160_vm7, 1.0, %v1013_v44 }
  0xac   :  { %938 = vmatprep.mubr.msk.f32.mxu0 %vm249_vm0, %v820_v22  ;;  %956 = vmatprep.mubr.msk.f32.mxu1 %vm249_vm0, %v832_v21 }
  0xad   :  { %v129_v23 = vpop.permute.xlu1 %128  ;;  %v93_v24 = vpop.permute.xlu0 %92 }
  0xae   :  { %vm173_vm8 = vcmp.eq.s32.totalorder %v129_v23, %v1153_v41  ;;  %vm161_vm9 = vcmp.eq.s32.totalorder %v93_v24, %v1153_v41 }
  0xaf   :  { %v833_v25 = vsel %vm173_vm8, 1.0, %v1013_v44  ;;  %v821_v26 = vsel %vm161_vm9, 1.0, %v1013_v44 }
  0xb0   :  { %939 = vmatmul.mubr.msk.f32.gmra.mrb[12].mxu0 %vm249_vm0, %v821_v26  ;;  %957 = vmatmul.mubr.msk.f32.gmra.mrb[8].mxu1 %vm249_vm0, %v833_v25 }
  0xb1   :  { %v132_v27 = vpop.permute.xlu1 %131  ;;  %v96_v28 = vpop.permute.xlu0 %95 }
  0xb2   :  { %vm174_vm10 = vcmp.eq.s32.totalorder %v132_v27, %v1153_v41  ;;  %vm162_vm11 = vcmp.eq.s32.totalorder %v96_v28, %v1153_v41 }
  0xb3   :  { %v834_v29 = vsel %vm174_vm10, 1.0, %v1013_v44  ;;  %v822_v30 = vsel %vm162_vm11, 1.0, %v1013_v44 }
  0xb4   :  { %941 = vmatprep.mubr.msk.f32.mxu0 %vm249_vm0, %v822_v30  ;;  %959 = vmatprep.mubr.msk.f32.mxu1 %vm249_vm0, %v834_v29 }
  0xb5   :  { %v135_v31 = vpop.permute.xlu1 %134  ;;  %v99_v32 = vpop.permute.xlu0 %98 }
  0xb6   :  { %vm175_vm12 = vcmp.eq.s32.totalorder %v135_v31, %v1153_v41  ;;  %vm163_vm13 = vcmp.eq.s32.totalorder %v99_v32, %v1153_v41 }
  0xb7   :  { %v835_v33 = vsel %vm175_vm12, 1.0, %v1013_v44  ;;  %v823_v34 = vsel %vm163_vm13, 1.0, %v1013_v44 }
  0xb8   :  { %942 = vmatmul.mubr.msk.f32.gmra.mrb[14].mxu0 %vm249_vm0, %v823_v34  ;;  %960 = vmatmul.mubr.msk.f32.gmra.mrb[10].mxu1 %vm249_vm0, %v835_v33 }
  0xb9   :  { %v141_v35 = vpop.permute.xlu1 %140  ;;  %v138_v36 = vpop.permute.xlu0 %137 }
  0xba   :  { %vm177_vm14 = vcmp.eq.s32.totalorder %v141_v35, %v1153_v41  ;;  %vm176_vm15 = vcmp.eq.s32.totalorder %v138_v36, %v1153_v41 }
  0xbb   :  { %v837_v37 = vsel %vm177_vm14, 1.0, %v1013_v44  ;;  %v836_v38 = vsel %vm176_vm15, 1.0, %v1013_v44 }
  0xbc   :  { %962 = vmatprep.mubr.msk.f32.mxu1 %vm249_vm0, %v836_v38 }
  0xbd   :  { %v147_v39 = vpop.permute.xlu1 %146  ;;  %963 = vmatmul.mubr.msk.f32.gmra.mrb[12].mxu1 %vm249_vm0, %v837_v37  ;;  %v144_v42 = vpop.permute.xlu0 %143 }
  0xbe   :  { %vm179_vm1 = vcmp.eq.s32.totalorder %v147_v39, %v1153_v41  ;;  %vm178_vm2 = vcmp.eq.s32.totalorder %v144_v42, %v1153_v41 }
  0xbf   :  { %v839_v43 = vsel %vm179_vm1, 1.0, %v1013_v44  ;;  %v838_v45 = vsel %vm178_vm2, 1.0, %v1013_v44 }
  0xc0   :  { %965 = vmatprep.mubr.msk.f32.mxu1 %vm249_vm0, %v838_v45 }
  0xc1   :  { %966 = vmatmul.mubr.msk.f32.gmra.mrb[14].mxu1 %vm249_vm0, %v839_v43  ;;  %vm724_vm0 = vcmask 523264  }
 0x15b   :  { %v922_v51 = vpop.f32.mrb[0].mxu0 }
 0x15c   :  { %v412_v41 = vpop.f32.mrb[1].mxu0  ;;  %v577_v55 = vmul.f32 %v922_v51, %v1255_v50 }
 0x15d   :  { %v576_v44 = vmul.f32 %v1255_v50, %v412_v41 }
 0x15f   :  { %v925_v54 = vpop.f32.mrb[2].mxu0 }
 0x160   :  { %v609_v40 = vmul.f32 %v925_v54, %v1257_v52  ;;  %v422_v56 = vpop.f32.mrb[3].mxu0  ;;  %v579_v0 = vmul.f32 %v925_v54, %v1255_v50 }
 0x161   :  { %v578_v58 = vmul.f32 %v1255_v50, %v422_v56  ;;  %v608_v59 = vmul.f32 %v1257_v52, %v422_v56 }
 0x162   :  { %v637_v60 = vadd.f32 %v609_v40, %v577_v55 }
 0x163   :  { %v636_v61 = vadd.f32 %v608_v59, %v576_v44  ;;  %v928_v62 = vpop.f32.mrb[4].mxu0  ;;  %v1266_v63 = vpop.f32.mrb[0].mxu1 }
 0x164   :  { %v611_v1 = vmul.f32 %v928_v62, %v1257_v52  ;;  %v669_v2 = vmul.f32 %v928_v62, %v1262_v57  ;;  %v432_v3 = vpop.f32.mrb[5].mxu0  ;;  %v492_v4 = vpop.f32.mrb[1].mxu1  ;;  %v581_v17 = vmul.f32 %v928_v62, %v1255_v50  ;;  %v593_v22 = vmul.f32 %v1266_v63, %v1255_v50 }
 0x165   :  { %v580_v5 = vmul.f32 %v1255_v50, %v432_v3  ;;  %v610_v6 = vmul.f32 %v1257_v52, %v432_v3  ;;  %v668_v9 = vmul.f32 %v1262_v57, %v432_v3  ;;  %v592_v10 = vmul.f32 %v1255_v50, %v492_v4 }
 0x166   :  { %v639_v7 = vadd.f32 %v611_v1, %v579_v0  ;;  %v697_v8 = vadd.f32 %v669_v2, %v637_v60  ;;  %v1276_v12 = vmul.f32 %v1257_v52, %v492_v4  ;;  %v1279_v13 = vmul.f32 %v1262_v57, %v492_v4 }
 0x167   :  { %v638_v11 = vadd.f32 %v610_v6, %v578_v58  ;;  %v696_v14 = vadd.f32 %v668_v9, %v636_v61 }
 0x168   :  { %v1313_v59 = vsel %vm724_vm0, %v697_v8, -inf }
 0x169   :  { %v1322_v2 = vsel %vm724_vm0, %v696_v14, -inf }
 0x16b   :  { %v931_v15 = vpop.f32.mrb[6].mxu0  ;;  %v1281_v16 = vpop.f32.mrb[2].mxu1 }
 0x16c   :  { %v613_v18 = vmul.f32 %v931_v15, %v1257_v52  ;;  %v671_v19 = vmul.f32 %v931_v15, %v1262_v57  ;;  %v442_v20 = vpop.f32.mrb[7].mxu0  ;;  %v502_v21 = vpop.f32.mrb[3].mxu1  ;;  %v625_v23 = vmul.f32 %v1281_v16, %v1257_v52  ;;  %v583_v38 = vmul.f32 %v931_v15, %v1255_v50 }
 0x16d   :  { %v582_v24 = vmul.f32 %v1255_v50, %v442_v20  ;;  %v612_v25 = vmul.f32 %v1257_v52, %v442_v20  ;;  %v670_v28 = vmul.f32 %v1262_v57, %v442_v20  ;;  %v594_v29 = vmul.f32 %v1255_v50, %v502_v21 }
 0x16e   :  { %v641_v26 = vadd.f32 %v613_v18, %v581_v17  ;;  %v699_v27 = vadd.f32 %v671_v19, %v639_v7  ;;  %v653_v30 = vadd.f32 %v625_v23, %v593_v22  ;;  %v624_v32 = vmul.f32 %v1257_v52, %v502_v21 }
 0x16f   :  { %v640_v31 = vadd.f32 %v612_v25, %v580_v5  ;;  %v1296_v33 = vmul.f32 %v1262_v57, %v502_v21  ;;  %v698_v34 = vadd.f32 %v670_v28, %v638_v11  ;;  %v595_v39 = vmul.f32 %v1281_v16, %v1255_v50 }
 0x170   :  { %v652_v35 = vadd.f32 %v624_v32, %v592_v10  ;;  %v1330_v8 = vsel %vm724_vm0, %v699_v27, -inf }
 0x173   :  { %v934_v36 = vpop.f32.mrb[8].mxu0  ;;  %v952_v37 = vpop.f32.mrb[4].mxu1 }
 0x174   :  { %v615_v42 = vmul.f32 %v934_v36, %v1257_v52  ;;  %v673_v43 = vmul.f32 %v934_v36, %v1262_v57  ;;  %v452_v45 = vpop.f32.mrb[9].mxu0  ;;  %v512_v46 = vpop.f32.mrb[5].mxu1  ;;  %v627_v47 = vmul.f32 %v952_v37, %v1257_v52  ;;  %v685_v48 = vmul.f32 %v952_v37, %v1262_v57 }
 0x175   :  { %v584_v49 = vmul.f32 %v1255_v50, %v452_v45  ;;  %v614_v51 = vmul.f32 %v1257_v52, %v452_v45  ;;  %v672_v44 = vmul.f32 %v1262_v57, %v452_v45  ;;  %v596_v54 = vmul.f32 %v1255_v50, %v512_v46 }
 0x176   :  { %v643_v41 = vadd.f32 %v615_v42, %v583_v38  ;;  %v701_v53 = vadd.f32 %v673_v43, %v641_v26  ;;  %v655_v55 = vadd.f32 %v627_v47, %v595_v39  ;;  %v1309_v40 = vadd.f32 %v685_v48, %v653_v30 }
 0x177   :  { %v642_v56 = vadd.f32 %v614_v51, %v582_v24  ;;  %v626_v58 = vmul.f32 %v1257_v52, %v512_v46  ;;  %v700_v61 = vadd.f32 %v672_v44, %v640_v31  ;;  %v684_v62 = vmul.f32 %v1262_v57, %v512_v46 }
 0x178   :  { %v1316_v60 = vsel %vm724_vm0, %v701_v53, -inf  ;;  %v585_v9 = vmul.f32 %v934_v36, %v1255_v50  ;;  %v597_v17 = vmul.f32 %v952_v37, %v1255_v50  ;;  %v1350_v37 = vsel %vm724_vm0, %v698_v34, -inf }
 0x179   :  { %v755_v0 = vmax.f32 %v1313_v59, %v1316_v60  ;;  %v654_v1 = vadd.f32 %v626_v58, %v594_v29  ;;  %v1325_v3 = vsel %vm724_vm0, %v700_v61, -inf  ;;  %v712_v4 = vadd.f32 %v684_v62, %v652_v35 }
 0x17a   :  { %v728_v5 = vmax.f32 %v1322_v2, %v1325_v3  ;;  %v623_v42 = vmul.f32 %v1266_v63, %v1257_v52  ;;  %v681_v47 = vmul.f32 %v1266_v63, %v1262_v57 }
 0x17b   :  { %v937_v6 = vpop.f32.mrb[10].mxu0  ;;  %v955_v7 = vpop.f32.mrb[6].mxu1 }
 0x17c   :  { %v617_v10 = vmul.f32 %v937_v6, %v1257_v52  ;;  %v675_v11 = vmul.f32 %v937_v6, %v1262_v57  ;;  %v462_v14 = vpop.f32.mrb[11].mxu0  ;;  %v522_v15 = vpop.f32.mrb[7].mxu1  ;;  %v629_v18 = vmul.f32 %v955_v7, %v1257_v52  ;;  %v687_v19 = vmul.f32 %v955_v7, %v1262_v57 }
 0x17d   :  { %v586_v20 = vmul.f32 %v1255_v50, %v462_v14  ;;  %v616_v23 = vmul.f32 %v1257_v52, %v462_v14  ;;  %v674_v24 = vmul.f32 %v1262_v57, %v462_v14  ;;  %v598_v27 = vmul.f32 %v1255_v50, %v522_v15 }
 0x17e   :  { %v645_v21 = vadd.f32 %v617_v10, %v585_v9  ;;  %v703_v22 = vadd.f32 %v675_v11, %v643_v41  ;;  %v657_v25 = vadd.f32 %v629_v18, %v597_v17  ;;  %v715_v26 = vadd.f32 %v687_v19, %v655_v55 }
 0x17f   :  { %v628_v28 = vmul.f32 %v1257_v52, %v522_v15  ;;  %v644_v30 = vadd.f32 %v616_v23, %v584_v49  ;;  %v702_v31 = vadd.f32 %v674_v24, %v642_v56  ;;  %v686_v32 = vmul.f32 %v1262_v57, %v522_v15 }
 0x180   :  { %v1344_v29 = vsel %vm724_vm0, %v703_v22, -inf  ;;  %v587_v48 = vmul.f32 %v937_v6, %v1255_v50  ;;  %v599_v53 = vmul.f32 %v955_v7, %v1255_v50  ;;  %v683_v15 = vmul.f32 %v1281_v16, %v1262_v57 }
 0x181   :  { %v757_v35 = vmax.f32 %v1330_v8, %v1344_v29  ;;  %v656_v36 = vadd.f32 %v628_v28, %v596_v54  ;;  %v1353_v38 = vsel %vm724_vm0, %v702_v31, -inf  ;;  %v714_v39 = vadd.f32 %v686_v32, %v654_v1 }
 0x182   :  { %v730_v43 = vmax.f32 %v1350_v37, %v1353_v38  ;;  %v766_v17 = vsel %vm724_vm0, %v1309_v40, -inf  ;;  %v1387_v22 = vsel %vm724_vm0, %v715_v26, -inf }
 0x183   :  { %v940_v45 = vpop.f32.mrb[12].mxu0  ;;  %v958_v46 = vpop.f32.mrb[8].mxu1  ;;  %v1391_v24 = vsel %vm724_vm0, %v714_v39, -inf }
 0x184   :  { %v619_v34 = vmul.f32 %v940_v45, %v1257_v52  ;;  %v677_v49 = vmul.f32 %v940_v45, %v1262_v57  ;;  %v472_v51 = vpop.f32.mrb[13].mxu0  ;;  %v532_v41 = vpop.f32.mrb[9].mxu1  ;;  %v631_v44 = vmul.f32 %v958_v46, %v1257_v52  ;;  %v689_v54 = vmul.f32 %v958_v46, %v1262_v57 }
 0x185   :  { %v588_v55 = vmul.f32 %v1255_v50, %v472_v51  ;;  %v618_v63 = vmul.f32 %v1257_v52, %v472_v51  ;;  %v676_v61 = vmul.f32 %v1262_v57, %v472_v51  ;;  %v1371_v6 = vmul.f32 %v1255_v50, %v532_v41 }
 0x186   :  { %v647_v56 = vadd.f32 %v619_v34, %v587_v48  ;;  %v705_v58 = vadd.f32 %v677_v49, %v645_v21  ;;  %v659_v62 = vadd.f32 %v631_v44, %v599_v53  ;;  %v717_v1 = vadd.f32 %v689_v54, %v657_v25 }
 0x187   :  { %v630_v9 = vmul.f32 %v1257_v52, %v532_v41  ;;  %v646_v10 = vadd.f32 %v618_v63, %v586_v20  ;;  %v704_v11 = vadd.f32 %v676_v61, %v644_v30  ;;  %v688_v14 = vmul.f32 %v1262_v57, %v532_v41 }
 0x188   :  { %v758_v7 = vsel %vm724_vm0, %v705_v58, -inf  ;;  %v1384_v21 = vsel %vm724_vm0, %v712_v4, -inf  ;;  %v589_v16 = vmul.f32 %v940_v45, %v1255_v50  ;;  %v601_v40 = vmul.f32 %v958_v46, %v1255_v50 }
 0x189   :  { %v759_v18 = vmax.f32 %v755_v0, %v758_v7  ;;  %v658_v19 = vadd.f32 %v630_v9, %v598_v27  ;;  %v731_v20 = vsel %vm724_vm0, %v704_v11, -inf  ;;  %v716_v23 = vadd.f32 %v688_v14, %v656_v36 }
 0x18a   :  { %v732_v59 = vmax.f32 %v728_v5, %v731_v20  ;;  %v1399_v4 = vsel %vm724_vm0, %v717_v1, -inf }
 0x18b   :  { %v943_v60 = vpop.f32.mrb[14].mxu0  ;;  %v961_v0 = vpop.f32.mrb[10].mxu1  ;;  %v1405_v31 = vsel %vm724_vm0, %v716_v23, -inf }
 0x18c   :  { %v591_v25 = vmul.f32 %v943_v60, %v1255_v50  ;;  %v621_v26 = vmul.f32 %v943_v60, %v1257_v52  ;;  %v679_v27 = vmul.f32 %v943_v60, %v1262_v57  ;;  %v482_v28 = vpop.f32.mrb[15].mxu0  ;;  %v542_v30 = vpop.f32.mrb[11].mxu1  ;;  %v633_v32 = vmul.f32 %v961_v0, %v1257_v52 }
 0x18d   :  { %v691_v2 = vmul.f32 %v961_v0, %v1262_v57  ;;  %v590_v3 = vmul.f32 %v1255_v50, %v482_v28  ;;  %v620_v45 = vmul.f32 %v1257_v52, %v482_v28  ;;  %v678_v49 = vmul.f32 %v1262_v57, %v482_v28 }
 0x18e   :  { %v649_v5 = vadd.f32 %v621_v26, %v589_v16  ;;  %v651_v36 = vadd.f32 %v623_v42, %v591_v25  ;;  %v707_v39 = vadd.f32 %v679_v27, %v647_v56  ;;  %v661_v46 = vadd.f32 %v633_v32, %v601_v40 }
 0x18f   :  { %v719_v48 = vadd.f32 %v691_v2, %v659_v62  ;;  %v650_v34 = vadd.f32 %v1276_v12, %v590_v3  ;;  %v648_v44 = vadd.f32 %v620_v45, %v588_v55  ;;  %v603_v42 = vmul.f32 %v961_v0, %v1255_v50 }
 0x190   :  { %v709_v51 = vadd.f32 %v681_v47, %v649_v5  ;;  %v711_v41 = vadd.f32 %v683_v15, %v651_v36  ;;  %v760_v53 = vsel %vm724_vm0, %v707_v39, -inf  ;;  %v964_v54 = vpop.f32.mrb[12].mxu1  ;;  %v706_v56 = vadd.f32 %v678_v49, %v646_v10 }
 0x191   :  { %v761_v58 = vmax.f32 %v757_v35, %v760_v53  ;;  %v710_v63 = vadd.f32 %v1296_v33, %v650_v34  ;;  %v552_v61 = vpop.f32.mrb[13].mxu1  ;;  %v708_v47 = vadd.f32 %v1279_v13, %v648_v44  ;;  %v602_v1 = vmul.f32 %v1255_v50, %v542_v30 }
 0x192   :  { %v762_v12 = vsel %vm724_vm0, %v709_v51, -inf  ;;  %v764_v62 = vsel %vm724_vm0, %v711_v41, -inf  ;;  %v733_v7 = vsel %vm724_vm0, %v706_v56, -inf  ;;  %v632_v35 = vmul.f32 %v1257_v52, %v542_v30 }
 0x193   :  { %v763_v55 = vmax.f32 %v759_v18, %v762_v12  ;;  %v765_v9 = vmax.f32 %v761_v58, %v764_v62  ;;  %v737_v8 = vsel %vm724_vm0, %v710_v63, -inf  ;;  %v734_v29 = vmax.f32 %v730_v43, %v733_v7 }
 0x194   :  { %v735_v33 = vsel %vm724_vm0, %v708_v47, -inf  ;;  %v690_v10 = vmul.f32 %v1262_v57, %v542_v30  ;;  %v967_v11 = vpop.f32.mrb[14].mxu1  ;;  %v635_v50 = vmul.f32 %v964_v54, %v1257_v52  ;;  %v693_v14 = vmul.f32 %v964_v54, %v1262_v57 }
 0x195   :  { %v736_v13 = vmax.f32 %v732_v59, %v735_v33  ;;  %v767_v15 = vmax.f32 %v763_v55, %v766_v17  ;;  %v562_v18 = vpop.f32.mrb[15].mxu1  ;;  %v738_v20 = vmax.f32 %v734_v29, %v737_v8  ;;  %v660_v23 = vadd.f32 %v632_v35, %v1371_v6 }
 0x196   :  { %v718_v16 = vadd.f32 %v690_v10, %v658_v19  ;;  %v634_v37 = vmul.f32 %v1257_v52, %v552_v61  ;;  %v663_v38 = vadd.f32 %v635_v50, %v603_v42  ;;  %v721_v43 = vadd.f32 %v693_v14, %v661_v46 }
 0x197   :  { %v771_v40 = vmax.f32 %v767_v15, %v1399_v4  ;;  %v692_v60 = vmul.f32 %v1262_v57, %v552_v61  ;;  %v772_v59 = vsel %vm724_vm0, %v719_v48, -inf  ;;  %v740_v25 = vmax.f32 %v736_v13, %v1384_v21 }
 0x198   :  { %v662_v0 = vadd.f32 %v634_v37, %v602_v1  ;;  %v695_v17 = vmul.f32 %v967_v11, %v1262_v57  ;;  %v774_v26 = vsel %vm724_vm0, %v721_v43, -inf  ;;  %v769_v6 = vmax.f32 %v765_v9, %v1387_v22 }
 0x199   :  { %v720_v27 = vadd.f32 %v692_v60, %v660_v23  ;;  %v694_v52 = vmul.f32 %v1262_v57, %v562_v18  ;;  %v775_v19 = vmax.f32 %v771_v40, %v774_v26  ;;  %v744_v28 = vmax.f32 %v740_v25, %v1405_v31  ;;  %v872_v31 = vld [vmem:[%s1468_s3] ss:$0 sm:$0xff] }
 0x19a   :  { %v723_v4 = vadd.f32 %v695_v17, %v663_v38  ;;  %v742_v30 = vmax.f32 %v738_v20, %v1391_v24  ;;  %v745_v32 = vsel %vm724_vm0, %v718_v16, -inf  ;;  %v773_v21 = vmax.f32 %v769_v6, %v772_v59 }
 0x19b   :  { %v747_v2 = vsel %vm724_vm0, %v720_v27, -inf  ;;  %v722_v3 = vadd.f32 %v694_v52, %v662_v0 }
 0x19c   :  { %v748_v5 = vmax.f32 %v744_v28, %v747_v2  ;;  %v776_v36 = vsel %vm724_vm0, %v723_v4, -inf  ;;  %v746_v39 = vmax.f32 %v742_v30, %v745_v32 }
 0x19d   :  { %v777_v45 = vmax.f32 %v773_v21, %v776_v36  ;;  %v749_v22 = vsel %vm724_vm0, %v722_v3, -inf }
 0x19e   :  { %v750_v57 = vmax.f32 %v746_v39, %v749_v22 }
 0x19f   :  { %v778_v46 = vmax.f32 %v775_v19, %v777_v45 }
 0x1a0   :  { %v751_v24 = vmax.f32 %v748_v5, %v750_v57 }
 0x1a1   :  { %v787_v48 = vadd.f32 %v872_v31, %v778_v46 }
 0x1a2   :  { %v786_v34 = vadd.f32 %v872_v31, %v751_v24 }
 0x1a3   :  { %789 = vrot.lane.b32.xlu0 %v787_v48, %s1014_s11 }
 0x215   :  { %v790_v49 = vpop.permute.xlu0 %789 }
 0x216   :  { %v792_v51 = vsel %vm724_vm0, %v786_v34, %v790_v49 }
 0x217   :  { %793 = vst [vmem:[#allocation2] sm:$0xff] %v792_v51 }
 0x218   :  { %999 = shalt.err (!%p996_p4)
}
 0x219   :  { %s1000_s16 = scalar_lea.hbm %s1469_s4, 128 }
 0x21a   :  { %p1001_p5 = scmp.ne.s32.totalorder %s1469_s4, %s1000_s16  ;;  %p1004_p6 = scmp.lt.u32.totalorder %s1000_s16, %s1469_s4 }
 0x21c   :  { %p1006_p7 = pnand %p1004_p6, %p1001_p5 }
 0x21e   :  { %1009 = shalt.err (!%p1006_p7)
}
 0x21f   :  { %803 = dma.vmem_to_hbm [thread:$0]  %s801_s13, 128, %s1469_s4, [#allocation3]  }
 0x220   :  { %1010 = dma.done.wait [#allocation3], 128  }
 0x221   :  { %1011 = vsyncadd [#allocation3], 4294967168 }
 0x222   :  { %807 = vsyncpa [#allocation3], 1 }

</bundles_post_ra>
